<compile_context>
chip_gen: v7x
topology: tpu7x:2x2x1
jax: 0.10.0
libtpu: 0.0.40
codegen_flags: <defaults>
</compile_context>

<pallas_src>
import functools

import numpy as np
import jax
import jax.numpy as jnp
from jax import lax
from jax.experimental import pallas as pl
from jax.experimental.pallas import tpu as pltpu

_HIGHEST = lax.Precision.HIGHEST


def _round_up(x, m):
    return ((x + m - 1) // m) * m


# ----------------------------- Pallas kernels --------------------------------

def _returns_kernel(rew_ref, disc_ref, ret_ref, acc_ref, *, precision):
    """ret[b, t] = sum_{t'>=t} discount^(t'-t) rew[b, t'] as a tiled MXU matmul.

    Grid (b, j, k): b = batch row tile, j = output seq tile, k = contraction seq
    tile.  disc blocks with k < j are identically zero and are skipped.
    """
    j = pl.program_id(1)
    k = pl.program_id(2)

    @pl.when(k == 0)
    def _init():
        acc_ref[...] = jnp.zeros_like(acc_ref)

    @pl.when(k >= j)          # upper-triangular disc blocks are all-zero -> skip
    def _acc():
        acc_ref[...] += jnp.dot(rew_ref[...], disc_ref[...],
                                preferred_element_type=jnp.float32,
                                precision=precision)

    @pl.when(k == pl.num_programs(2) - 1)
    def _done():
        ret_ref[...] = acc_ref[...]


def _fill_features(feat_ref, obs_ref, col_start, *, d, n_rows, batch_size, tile_n):
    """Fill rows [0, 2d+4) of feat_ref with [obs, obs^2, t, t^2, t^3, 1].

    Layout is feature-major: feat_ref is (n_feat, tile_n) with columns = sample
    rows in seq-major order (global column r = t*batch_size + b).  Columns
    >= n_rows (OOB garbage of the boundary tile) are zeroed with jnp.where so
    they contribute nothing to the gram / value (NaN-safe, unlike multiply).
    Returns the boolean valid mask of shape (1, tile_n).
    """
    lane = lax.broadcasted_iota(jnp.int32, (1, tile_n), 1)
    col = col_start + lane
    vmask = col < n_rows                                        # (1, tile_n)
    obs = jnp.where(vmask, obs_ref[...], 0.0)                   # (d, tile_n)
    t = jnp.where(vmask, (col // batch_size).astype(jnp.float32) * 0.01, 0.0)
    feat_ref[0:d, :] = obs
    feat_ref[d:2 * d, :] = obs * obs
    feat_ref[2 * d:2 * d + 1, :] = t
    feat_ref[2 * d + 1:2 * d + 2, :] = t * t
    feat_ref[2 * d + 2:2 * d + 3, :] = t * t * t
    feat_ref[2 * d + 3:2 * d + 4, :] = vmask.astype(jnp.float32)
    return vmask


def _gram_kernel(obs_ref, y_ref, gram_ref, acc_ref, feat_ref, *,
                 d, n_rows, batch_size, tile_n, precision):
    """Partial gram = X_aug X_aug^T accumulated over column tiles.

    X_aug is feature-major (Faug, tile_n) with the returns folded in as the last
    feature row, so X^T X and X^T y come out of one NT matmul stream (contract
    last dims -> natively supported by the MXU, no per-step transpose).
    Grid (p, k): p = partial-gram split ("parallel", used by v7x megacore),
    k = column-tile reduction ("arbitrary").
    """
    p = pl.program_id(0)
    k = pl.program_id(1)

    @pl.when(k == 0)
    def _init():
        acc_ref[...] = jnp.zeros_like(acc_ref)

    # Unclamped global column start: dummy tiles of the last split land fully
    # past n_rows and are therefore entirely masked out by _fill_features.
    col_start = (p * pl.num_programs(1) + k) * tile_n
    vmask = _fill_features(feat_ref, obs_ref, col_start, d=d, n_rows=n_rows,
                           batch_size=batch_size, tile_n=tile_n)
    feat_ref[2 * d + 4:2 * d + 5, :] = jnp.where(vmask, y_ref[...], 0.0)

    feat = feat_ref[...]
    acc_ref[...] += lax.dot_general(
        feat, feat, (((1,), (1,)), ((), ())),
        preferred_element_type=jnp.float32, precision=precision)

    @pl.when(k == pl.num_programs(1) - 1)
    def _done():
        gram_ref[...] = acc_ref[...]


def _value_kernel(obs_ref, w_ref, val_ref, feat_ref, *, d, n_rows, batch_size, tile_n):
    """value tile (1, tile_n) = w^T X, built from the same in-kernel features.

    Output blocks are lane-dense (tile_n lanes wide) -> dense vst writeback.
    The reduction over the ~F feature rows is done on the VPU/XLU (sum over the
    sublane axis); the pass stays HBM-bound.
    """
    i = pl.program_id(0)
    _fill_features(feat_ref, obs_ref, i * tile_n, d=d, n_rows=n_rows,
                   batch_size=batch_size, tile_n=tile_n)
    val_ref[...] = jnp.sum(feat_ref[...] * w_ref[...], axis=0, keepdims=True)


# ------------------------------- Module port ---------------------------------

class LinearFeatureBaseline:
    """JAX/Pallas port of the PyTorch LinearFeatureBaseline forward pass."""

    def __init__(self, discount, input_size, reg_coeff=1e-5,
                 matmul_precision=_HIGHEST, row_tile=8192,
                 batch_tile=256, seq_tile=512, gram_splits=2):
        self.discount = float(discount)
        self.input_size = int(input_size)
        self._reg_coeff = float(reg_coeff)
        # On v5e lax.Precision.DEFAULT gives single-pass bf16 MXU matmuls;
        # HIGHEST is the default for exactness of the normal equations.
        self._precision = matmul_precision
        self._row_tile = int(row_tile)        # columns per gram/value tile
        self._batch_tile = int(batch_tile)    # returns: batch rows per tile
        self._seq_tile = int(seq_tile)        # returns: seq cols per tile
        self._gram_splits = int(gram_splits)  # parallel partial grams (v7x: 2 TCs)
        # Deterministic parameter init (torch zero-inits; forward re-fits it).
        self.weight = jnp.zeros((self.feature_size,), jnp.float32)

    @property
    def feature_size(self):
        return 2 * self.input_size + 4

    # -- discounted returns: (B, S) -> (B, S), tiled MXU matmul ----------------
    def _get_return(self, rew):
        B, S = rew.shape
        tile_b = _round_up(min(self._batch_tile, _round_up(B, 8)), 8)
        tile_s = _round_up(min(self._seq_tile, _round_up(S, 128)), 128)
        Bp, Sp = _round_up(B, tile_b), _round_up(S, tile_s)
        rew_p = jnp.zeros((Bp, Sp), jnp.float32).at[:B, :S].set(rew)

        # (Sp, Sp) lower-triangular discount-power matrix, built at trace time.
        idx = np.arange(Sp)
        dk = np.maximum(idx[:, None] - idx[None, :], 0)
        disc = np.where(idx[:, None] >= idx[None, :],
                        np.power(float(self.discount), dk), 0.0).astype(np.float32)

        ret = pl.pallas_call(
            functools.partial(_returns_kernel, precision=self._precision),
            out_shape=jax.ShapeDtypeStruct((Bp, Sp), jnp.float32),
            grid_spec=pltpu.PrefetchScalarGridSpec(
                num_scalar_prefetch=0,
                grid=(Bp // tile_b, Sp // tile_s, Sp // tile_s),
                in_specs=[
                    # clamp skipped (k<j) iterations to the first useful block so
                    # their DMAs are deduplicated (same block index -> no refetch)
                    pl.BlockSpec((tile_b, tile_s),
                                 lambda b, j, k: (b, jnp.maximum(k, j))),
                    pl.BlockSpec((tile_s, tile_s),
                                 lambda b, j, k: (jnp.maximum(k, j), j)),
                ],
                out_specs=pl.BlockSpec((tile_b, tile_s), lambda b, j, k: (b, j)),
                scratch_shapes=[pltpu.VMEM((tile_b, tile_s), jnp.float32)]),
            compiler_params=pltpu.CompilerParams(
                dimension_semantics=("parallel", "parallel", "arbitrary")),
        )(rew_p, jnp.asarray(disc))
        return ret[:B, :S]

    def __call__(self, obs, reward):
        return self.forward(obs, reward)

    def forward(self, obs, reward):
        # (D, N) observation matrix with seq-major columns r = t*B + b.  Only obs
        # and the returns row are ever streamed; the full feature matrix is never
        # materialized in HBM.
        obs_T = jnp.concatenate(
            [jnp.asarray(o).astype(jnp.float32).T for o in obs], axis=1)   # (D, N)
        rew = jnp.stack([jnp.asarray(r).astype(jnp.float32) for r in reward],
                        axis=1)                                            # (B, S)
        D, N = obs_T.shape
        B, S = rew.shape
        F = self.feature_size              # 2D + 4
        Fa = F + 1                         # + folded returns row

        # Discounted returns.  As in torch's fit(): seq-major feature rows are
        # paired with the batch-major flattened returns (that exact pairing is
        # preserved here).
        return_bs = self._get_return(rew)                  # (B, S)
        y_row = return_bs.reshape(1, N)

        # Column tiling, capped so double-buffered inputs + the feature scratch
        # stay well under the smallest default scoped-VMEM limit (v5e: 16 MiB).
        tile_n = _round_up(min(self._row_tile, _round_up(N, 128)), 128)
        per_128 = (2 * _round_up(D, 8) + 2 * 8 + _round_up(Fa, 8)) * 128 * 4
        max_tile = max(128, (10 * 1024 * 1024 // per_128) * 128)
        tile_n = min(tile_n, max_tile)
        nt = pl.cdiv(N, tile_n)
        P = max(1, min(self._gram_splits, nt))   # parallel partial grams (v7x)
        tpp = pl.cdiv(nt, P)

        # --- X^T X and X^T y in one tiled, accumulated MXU pass ---
        gram_parts = pl.pallas_call(
            functools.partial(_gram_kernel, d=D, n_rows=N, batch_size=B,
                              tile_n=tile_n, precision=self._precision),
            out_shape=jax.ShapeDtypeStruct((P, Fa, Fa), jnp.float32),
            grid_spec=pltpu.PrefetchScalarGridSpec(
                num_scalar_prefetch=0,
                grid=(P, tpp),
                in_specs=[
                    pl.BlockSpec((D, tile_n),
                                 lambda p, k: (0, jnp.minimum(p * tpp + k, nt - 1))),
                    pl.BlockSpec((1, tile_n),
                                 lambda p, k: (0, jnp.minimum(p * tpp + k, nt - 1))),
                ],
                out_specs=pl.BlockSpec((None, Fa, Fa), lambda p, k: (p, 0, 0)),
                scratch_shapes=[pltpu.VMEM((Fa, Fa), jnp.float32),
                                pltpu.VMEM((Fa, tile_n), jnp.float32)]),
            compiler_params=pltpu.CompilerParams(
                dimension_semantics=("parallel", "arbitrary")),
        )(obs_T, y_row)
        gram = jnp.sum(gram_parts, axis=0)
        xtx = gram[:F, :F]
        xty = gram[:F, F]

        # --- regularized normal-equation solve on the true F x F SPD block ---
        # torch's lstsq try/except escalation loop is emulated by trying 5 reg
        # values and selecting the first whose Cholesky solve is finite.
        # TODO(synk): torch raises if all 5 fail; here the weight stays zero.
        eye = jnp.eye(F, dtype=jnp.float32)
        w = jnp.zeros((F,), jnp.float32)
        chosen = jnp.bool_(False)
        reg = self._reg_coeff
        for _ in range(5):
            c = jax.scipy.linalg.cho_factor(xtx + reg * eye)
            wi = jax.scipy.linalg.cho_solve(c, xty)
            ok = jnp.all(jnp.isfinite(wi))
            w = jnp.where(jnp.logical_and(ok, jnp.logical_not(chosen)), wi, w)
            chosen = jnp.logical_or(chosen, ok)
            reg *= 10.0
        # NOTE: python-side mutation; valid only while forward() is not jit-compiled.
        self.weight = w

        # --- value = X @ w, lane-dense (1, tile_n) output blocks ---
        val = pl.pallas_call(
            functools.partial(_value_kernel, d=D, n_rows=N, batch_size=B,
                              tile_n=tile_n),
            out_shape=jax.ShapeDtypeStruct((1, nt * tile_n), jnp.float32),
            grid_spec=pltpu.PrefetchScalarGridSpec(
                num_scalar_prefetch=0,
                grid=(nt,),
                in_specs=[pl.BlockSpec((D, tile_n), lambda i: (0, i)),
                          pl.BlockSpec((F, 1), lambda i: (0, 0))],
                out_specs=pl.BlockSpec((1, tile_n), lambda i: (0, i)),
                scratch_shapes=[pltpu.VMEM((F, tile_n), jnp.float32)]),
            compiler_params=pltpu.CompilerParams(
                dimension_semantics=("parallel",)),
        )(obs_T, w.reshape(F, 1))

        value = val[0, :N].reshape(S, B).T                 # (B, S), as in torch
        return value


# --------------------------- Pure-JAX reference -------------------------------

def _reference_forward(obs, reward, discount, input_size, reg_coeff):
    obs = jnp.stack([jnp.asarray(o) for o in obs], axis=1).astype(jnp.float32)
    rew = jnp.stack([jnp.asarray(r) for r in reward], axis=1).astype(jnp.float32)
    B, S, D = obs.shape
    F = 2 * D + 4
    R = jnp.zeros((B,), jnp.float32)
    rets = [None] * S
    for t in range(S - 1, -1, -1):
        R = rew[:, t] + discount * R
        rets[t] = R
    return_ = jnp.stack(rets, axis=1)                    # (B, S)
    obs_t = jnp.transpose(obs, (1, 0, 2))
    ones = jnp.ones((S, B, 1), jnp.float32)
    ts = jnp.arange(S, dtype=jnp.float32).reshape(S, 1, 1) * ones / 100.0
    feats = jnp.concatenate([obs_t, obs_t ** 2, ts, ts ** 2, ts ** 3, ones], axis=2)
    featmat = feats.reshape(-1, F)
    returns = return_.reshape(-1, 1)
    xty = jnp.matmul(featmat.T, returns, precision=_HIGHEST)
    xtx = jnp.matmul(featmat.T, featmat, precision=_HIGHEST)
    w = jnp.linalg.solve(xtx + reg_coeff * jnp.eye(F, dtype=jnp.float32), xty).reshape(-1)
    value = jnp.matmul(featmat, w, precision=_HIGHEST)
    return value.reshape(S, B).T


if __name__ == "__main__":
    B, S, D = 2, 8, 4          # batch, episode horizon (seq), input_size
    discount = 0.99

    key = jax.random.PRNGKey(0)
    k_obs, k_rew = jax.random.split(key)
    obs_list = [jax.random.normal(jax.random.fold_in(k_obs, t), (B, D), jnp.float32)
                for t in range(S)]
    reward_list = [jax.random.normal(jax.random.fold_in(k_rew, t), (B,), jnp.float32)
                   for t in range(S)]

    model = LinearFeatureBaseline(discount=discount, input_size=D)
    value = jax.block_until_ready(model(obs_list, reward_list))

    assert value.shape == (B, S), value.shape
    ref = jax.block_until_ready(
        _reference_forward(obs_list, reward_list, discount, D, 1e-5))
    np.testing.assert_allclose(np.asarray(value), np.asarray(ref), rtol=5e-2, atol=5e-2)

    print("KERNEL_OK")
</pallas_src>

<mosaic_0001>
module attributes {stable_mosaic.version = 11 : i64} {
  func.func @_returns_kernel(%arg0: i32, %arg1: i32, %arg2: i32, %arg3: memref<8x128xf32, #tpu.memory_space<vmem>>, %arg4: memref<128x128xf32, #tpu.memory_space<vmem>>, %arg5: memref<8x128xf32, #tpu.memory_space<vmem>>, %arg6: memref<8x128xf32, #tpu.memory_space<vmem>>) attributes {dimension_semantics = [#tpu.dimension_semantics<parallel>, #tpu.dimension_semantics<parallel>, #tpu.dimension_semantics<arbitrary>], iteration_bounds = array<i64: 1, 1, 1>, scalar_prefetch = 0 : i64, scratch_operands = 1 : i64, tpu.core_type = #tpu.core_type<tc>, window_params = [{transform_indices = @transform_0, window_bounds = array<i64: 8, 128>}, {transform_indices = @transform_1, window_bounds = array<i64: 128, 128>}, {transform_indices = @transform_2, window_bounds = array<i64: 8, 128>}]} {
    %c0_i32 = arith.constant 0 : i32
    %0 = arith.cmpi eq, %arg2, %c0_i32 : i32
    %1 = arith.extui %0 : i1 to i32
    %c0_i32_0 = arith.constant 0 : i32
    %2 = arith.cmpi ne, %1, %c0_i32_0 : i32
    scf.if %2 {
      %cst = arith.constant 0.000000e+00 : f32
      %9 = vector.broadcast %cst : f32 to vector<8x128xf32>
      %c0 = arith.constant 0 : index
      %c0_4 = arith.constant 0 : index
      %10 = vector.load %arg6[%c0, %c0_4] : memref<8x128xf32, #tpu.memory_space<vmem>>, vector<8x128xf32>
      tpu.vector_store %arg6[%c0, %c0_4], %9 {strides = array<i32>} : memref<8x128xf32, #tpu.memory_space<vmem>>, vector<8x128xf32>,
    } else {
    }
    %3 = arith.cmpi sge, %arg2, %arg1 : i32
    %4 = arith.extui %3 : i1 to i32
    %c0_i32_1 = arith.constant 0 : i32
    %5 = arith.cmpi ne, %4, %c0_i32_1 : i32
    scf.if %5 {
      %c0 = arith.constant 0 : index
      %c0_4 = arith.constant 0 : index
      %9 = vector.load %arg6[%c0, %c0_4] : memref<8x128xf32, #tpu.memory_space<vmem>>, vector<8x128xf32>
      %c0_5 = arith.constant 0 : index
      %c0_6 = arith.constant 0 : index
      %10 = vector.load %arg3[%c0_5, %c0_6] : memref<8x128xf32, #tpu.memory_space<vmem>>, vector<8x128xf32>
      %c0_7 = arith.constant 0 : index
      %c0_8 = arith.constant 0 : index
      %11 = vector.load %arg4[%c0_7, %c0_8] : memref<128x128xf32, #tpu.memory_space<vmem>>, vector<128x128xf32>
      %cst = arith.constant dense<0.000000e+00> : vector<8x128xf32>
      %12 = tpu.matmul %10, %11, %cst {dimension_numbers = #tpu.dot_dimension_numbers<[1], [0], [0], [1], [0, 0, 1, 1], [], []>, precision = #tpu.contract_precision<fp32>} : vector<8x128xf32>, vector<128x128xf32>, vector<8x128xf32> -> vector<8x128xf32>
      %13 = arith.addf %9, %12 : vector<8x128xf32>
      %c0_9 = arith.constant 0 : index
      %c0_10 = arith.constant 0 : index
      %14 = vector.load %arg6[%c0_9, %c0_10] : memref<8x128xf32, #tpu.memory_space<vmem>>, vector<8x128xf32>
      tpu.vector_store %arg6[%c0_9, %c0_10], %13 {strides = array<i32>} : memref<8x128xf32, #tpu.memory_space<vmem>>, vector<8x128xf32>,
    } else {
    }
    %c0_i32_2 = arith.constant 0 : i32
    %6 = arith.cmpi eq, %arg2, %c0_i32_2 : i32
    %7 = arith.extui %6 : i1 to i32
    %c0_i32_3 = arith.constant 0 : i32
    %8 = arith.cmpi ne, %7, %c0_i32_3 : i32
    scf.if %8 {
      %c0 = arith.constant 0 : index
      %c0_4 = arith.constant 0 : index
      %9 = vector.load %arg6[%c0, %c0_4] : memref<8x128xf32, #tpu.memory_space<vmem>>, vector<8x128xf32>
      %c0_5 = arith.constant 0 : index
      %c0_6 = arith.constant 0 : index
      %10 = vector.load %arg5[%c0_5, %c0_6] : memref<8x128xf32, #tpu.memory_space<vmem>>, vector<8x128xf32>
      tpu.vector_store %arg5[%c0_5, %c0_6], %9 {strides = array<i32>} : memref<8x128xf32, #tpu.memory_space<vmem>>, vector<8x128xf32>,
    } else {
    }
    return
  }
  func.func @transform_0(%arg0: i32, %arg1: i32, %arg2: i32) -> (i32, i32) {
    %0 = arith.maxsi %arg2, %arg1 : i32
    %c0_i32 = arith.constant 0 : i32
    return %arg0, %0 : i32, i32
  }
  func.func @transform_1(%arg0: i32, %arg1: i32, %arg2: i32) -> (i32, i32) {
    %0 = arith.maxsi %arg2, %arg1 : i32
    %c0_i32 = arith.constant 0 : i32
    return %0, %arg1 : i32, i32
  }
  func.func @transform_2(%arg0: i32, %arg1: i32, %arg2: i32) -> (i32, i32) {
    %c0_i32 = arith.constant 0 : i32
    return %arg0, %arg1 : i32, i32
  }
}

</mosaic_0001>

<bundles_post_ra>
// kernel: tpu_custom_call.1
= control target key start
LH: loop header
LB: loop body
LE: loop exit
PB: predicated region body
PF: predicated region fallthrough
CT: control target
= control target key end

     0   :  { %7 = vsyncpa [#allocation4], 0  ;;  %s1587_s0 = inlined_call_operand.hbm [shape: f32[8,128], index: 0, kind: input, shape index: {}]   ;;  %s1588_s1 = inlined_call_operand.hbm [shape: f32[128,128], index: 1, kind: input, shape index: {}]   ;;  %s1589_s2 = inlined_call_operand.hbm [shape: f32[8,128], index: 2, kind: output, shape index: {}]  }
   0x1   :  { %8 = vsyncpa [#allocation7], 0 }
   0x2   :  { %9 = vsyncpa [#allocation5], 0  ;;  %s1274_s9 = smov [#allocation3]   ;;  %s1275_s11 = smov [#allocation6]  }
   0x3   :  { %s16_s10 = sshll.u32 %s1274_s9, 4  ;;  %s25_s12 = sshll.u32 %s1275_s11, 4  ;;  %s17_s10 = int_to_ptr.vmem [resolvable:$true] %s16_s10  ;;  %s1297_s12 = int_to_ptr.vmem [resolvable:$true] %s25_s12 }
   0x4   :  { %s1202_s15 = scalar_lea.hbm %s1587_s0, 128 }
   0x5   :  { %p1203_p0 = scmp.ne.s32.totalorder %s1587_s0, %s1202_s15  ;;  %p1206_p1 = scmp.lt.u32.totalorder %s1202_s15, %s1587_s0 }
   0x7   :  { %p1208_p2 = pnand %p1206_p1, %p1203_p0 }
   0x9   :  { %1211 = shalt.err (!%p1208_p2)
}
   0xa   :  { %s1212_s20 = scalar_lea.vmem %s17_s10, 128  ;;  %p1217_p4 = scmp.lt.s32.totalorder %s17_s10, %s17_s10 }
   0xb   :  { %p1213_p3 = scmp.ne.s32.totalorder %s17_s10, %s1212_s20  ;;  %p1218_p5 = scmp.lt.s32.totalorder %s1212_s20, %s1212_s20 }
   0xd   :  { %p1219_p6 = por %p1218_p5, %p1217_p4 }
   0xf   :  { %p1220_p7 = pnand %p1219_p6, %p1213_p3 }
  0x11   :  { %1223 = shalt.err (!%p1220_p7)
}
  0x12   :  { %19 = dma.hbm_to_vmem [thread:$0]  %s1587_s0, 128, %s17_s10, [#allocation4]  }
  0x13   :  { %s1224_s25 = scalar_lea.hbm %s1588_s1, 2048 }
  0x14   :  { %p1225_p8 = scmp.ne.s32.totalorder %s1588_s1, %s1224_s25  ;;  %p1228_p9 = scmp.lt.u32.totalorder %s1224_s25, %s1588_s1 }
  0x16   :  { %p1230_p10 = pnand %p1228_p9, %p1225_p8 }
  0x18   :  { %1233 = shalt.err (!%p1230_p10)
}
  0x19   :  { %s1234_s30 = scalar_lea.vmem %s1297_s12, 2048  ;;  %p1239_p12 = scmp.lt.s32.totalorder %s1297_s12, %s1297_s12 }
  0x1a   :  { %p1235_p11 = scmp.ne.s32.totalorder %s1297_s12, %s1234_s30  ;;  %p1240_p13 = scmp.lt.s32.totalorder %s1234_s30, %s1234_s30 }
  0x1c   :  { %p1241_p0 = por %p1240_p13, %p1239_p12 }
  0x1e   :  { %p1242_p1 = pnand %p1241_p0, %p1235_p11 }
  0x20   :  { %1245 = shalt.err (!%p1242_p1)
}
  0x21   :  { %s1276_s0 = smov 128   ;;  %s1277_s3 = smov 8  }
  0x22   :  { %31 = dma.hbm_to_vmem [thread:$0]  %s1588_s1, 2048, %s1297_s12, [#allocation7], %s1276_s0, %s1276_s0, %s1277_s3  }
  0x23   :  { %1268 = dma.done.wait [#allocation4], 128  }
  0x24   :  { %1269 = vsyncadd [#allocation4], 4294967168 }
  0x25   :  { %1270 = dma.done.wait [#allocation7], 2048  }
  0x26   :  { %1271 = vsyncadd [#allocation7], 4294965248  ;;  %v1278_v0 = vmov 0.0|0.0   ;;  %vm1279_vm0 = vmmov 0   ;;  %v1280_v1 = vmov 0.0   ;;  %v49_v2 = vld [vmem:[#allocation6] sm:$0xff] }
  0x27   :  { %1041 = vmatprep.subr.bf16.mxu1 %v1278_v0  ;;  %1113 = vmatprep.subr.bf16.mxu0 %v1278_v0  ;;  %v50_v3 = vld [vmem:[#allocation6 + $0x8] sm:$0xff]  ;;  %v51_v4 = vld [vmem:[#allocation6 + $0x10] sm:$0xff]  ;;  %v66_v5 = vand.u32 4294901760, %v49_v2  ;;  %v52_v7 = vld [vmem:[#allocation6 + $0x18] sm:$0xff]  ;;  %s1281_s1 = smov [#allocation8]  }
  0x28   :  { %863 = vmatprep.mubr.msk.f32.mxu1 %vm1279_vm0, %v1280_v1  ;;  %968 = vmatprep.mubr.msk.f32.mxu0 %vm1279_vm0, %v1280_v1  ;;  %v69_v6 = vand.u32 4294901760, %v50_v3  ;;  %v72_v8 = vand.u32 4294901760, %v51_v4  ;;  %v75_v9 = vand.u32 4294901760, %v52_v7  ;;  %v53_v10 = vld [vmem:[#allocation6 + $0x20] sm:$0xff]  ;;  %v54_v11 = vld [vmem:[#allocation6 + $0x28] sm:$0xff]  ;;  %v55_v16 = vld [vmem:[#allocation6 + $0x30] sm:$0xff] }
  0x29   :  { %v78_v14 = vand.u32 4294901760, %v53_v10  ;;  %v81_v15 = vand.u32 4294901760, %v54_v11  ;;  %v56_v17 = vld [vmem:[#allocation6 + $0x38] sm:$0xff]  ;;  %v84_v19 = vand.u32 4294901760, %v55_v16  ;;  %v1348_v21 = vld [vmem:[#allocation6 + $0x40] sm:$0xff]  ;;  %v1350_v22 = vld [vmem:[#allocation6 + $0x48] sm:$0xff]  ;;  %v1364_v29 = vsub.f32 %v49_v2, %v66_v5 }
  0x2a   :  { %v1334_v12 = vpack.c.bf16 %v69_v6, %v66_v5  ;;  %v1338_v13 = vpack.c.bf16 %v75_v9, %v72_v8  ;;  %v87_v20 = vand.u32 4294901760, %v56_v17  ;;  %v90_v24 = vand.u32 4294901760, %v1348_v21  ;;  %v48_v26 = vld [vmem:[#allocation3] sm:$0xff]  ;;  %v1360_v27 = vld [vmem:[#allocation6 + $0x50] sm:$0xff]  ;;  %v1376_v35 = vld [vmem:[#allocation6 + $0x60] sm:$0xff]  ;;  %s719_s6 = sshll.u32 %s1281_s1, 4  ;;  %s720_s6 = int_to_ptr.vmem [resolvable:$true] %s719_s6 }
  0x2b   :  { %v1344_v18 = vpack.c.bf16 %v81_v15, %v78_v14  ;;  %v93_v25 = vand.u32 4294901760, %v1350_v22  ;;  %v1362_v28 = vld [vmem:[#allocation6 + $0x58] sm:$0xff]  ;;  %v1366_v30 = vand.u32 4294901760, %v48_v26  ;;  %v1368_v31 = vsub.f32 %v50_v3, %v69_v6  ;;  %v1380_v36 = vld [vmem:[#allocation6 + $0x68] sm:$0xff]  ;;  %v1399_v43 = vld [vmem:[#allocation6 + $0x70] sm:$0xff]  ;;  %s1246_s7 = scalar_lea.vmem %s720_s6, 128  ;;  %p1251_p3 = scmp.lt.s32.totalorder %s720_s6, %s720_s6 }
  0x2c   :  { %1043 = vmatpush3.bf16.msra.mxu1 %v1334_v12  ;;  %1115 = vmatpush3.bf16.msra.mxu0 %v1334_v12  ;;  %v1354_v23 = vpack.c.bf16 %v87_v20, %v84_v19  ;;  %v96_v33 = vand.u32 4294901760, %v1360_v27  ;;  %v99_v34 = vand.u32 4294901760, %v1362_v28  ;;  %v1382_v37 = vsub.f32 %v51_v4, %v72_v8  ;;  %v1401_v44 = vld [vmem:[#allocation6 + $0x78] sm:$0xff]  ;;  %p1247_p2 = scmp.ne.s32.totalorder %s720_s6, %s1246_s7  ;;  %p1252_p4 = scmp.lt.s32.totalorder %s1246_s7, %s1246_s7 }
  0x2d   :  { %1044 = vmatprep.subr.bf16.mxu1 %v1278_v0  ;;  %1116 = vmatprep.subr.bf16.mxu0 %v1278_v0  ;;  %v1372_v32 = vpack.c.bf16 %v93_v25, %v90_v24  ;;  %v1384_v38 = vsub.f32 %v52_v7, %v75_v9  ;;  %v102_v39 = vand.u32 4294901760, %v1376_v35  ;;  %v1388_v40 = vsub.f32 %v48_v26, %v1366_v30 }
  0x2e   :  { %v1396_v41 = vpack.c.bf16 %v99_v34, %v96_v33  ;;  %v105_v42 = vand.u32 4294901760, %v1380_v36  ;;  %v159_v45 = vand.u32 4294901760, %v1364_v29  ;;  %v166_v46 = vand.u32 4294901760, %v1368_v31  ;;  %p1253_p5 = por %p1252_p4, %p1251_p3 }
  0x2f   :  { %v1407_v47 = vsub.f32 %v53_v10, %v78_v14  ;;  %v1409_v48 = vsub.f32 %v54_v11, %v81_v15  ;;  %v108_v49 = vand.u32 4294901760, %v1399_v43  ;;  %v111_v50 = vand.u32 4294901760, %v1401_v44 }
  0x30   :  { %1046 = vmatpush3.bf16.msra.mxu1 %v1338_v13  ;;  %1118 = vmatpush3.bf16.msra.mxu0 %v1338_v13  ;;  %v148_v51 = vand.u32 4294901760, %v1388_v40  ;;  %v173_v52 = vand.u32 4294901760, %v1382_v37  ;;  %v1421_v53 = vpack.c.bf16 %v105_v42, %v102_v39  ;;  %v160_v54 = vsub.f32 %v1364_v29, %v159_v45  ;;  %p1254_p6 = pnand %p1253_p5, %p1247_p2 }
  0x31   :  { %1047 = vmatprep.subr.bf16.mxu1 %v1278_v0  ;;  %1119 = vmatprep.subr.bf16.mxu0 %v1278_v0  ;;  %v167_v55 = vsub.f32 %v1368_v31, %v166_v46  ;;  %v180_v56 = vand.u32 4294901760, %v1384_v38  ;;  %v1428_v57 = vsub.f32 %v55_v16, %v84_v19  ;;  %v1430_v58 = vsub.f32 %v56_v17, %v87_v20 }
  0x32   :  { %v149_v59 = vsub.f32 %v1388_v40, %v148_v51  ;;  %v174_v60 = vsub.f32 %v1382_v37, %v173_v52  ;;  %v187_v61 = vand.u32 4294901760, %v1407_v47  ;;  %v194_v62 = vand.u32 4294901760, %v1409_v48 }
  0x33   :  { %v1442_v63 = vpack.c.bf16 %v111_v50, %v108_v49  ;;  %v161_v2 = vand.u32 4294901760, %v160_v54  ;;  %v168_v3 = vand.u32 4294901760, %v167_v55  ;;  %v181_v4 = vsub.f32 %v1384_v38, %v180_v56 }
  0x34   :  { %1049 = vmatpush3.bf16.msra.mxu1 %v1344_v18  ;;  %1121 = vmatpush3.bf16.msra.mxu0 %v1344_v18  ;;  %v1448_v5 = vsub.f32 %v1348_v21, %v90_v24  ;;  %v1451_v6 = vsub.f32 %v1350_v22, %v93_v25  ;;  %v1138_v7 = vpack.c.bf16 %v166_v46, %v159_v45  ;;  %v150_v8 = vand.u32 4294901760, %v149_v59 }
  0x35   :  { %1050 = vmatprep.subr.bf16.mxu1 %v1278_v0  ;;  %1122 = vmatprep.subr.bf16.mxu0 %v1278_v0  ;;  %v175_v9 = vand.u32 4294901760, %v174_v60  ;;  %v188_v10 = vsub.f32 %v1407_v47, %v187_v61  ;;  %v195_v11 = vsub.f32 %v1409_v48, %v194_v62  ;;  %v1066_v14 = vpack.c.bf16 %v168_v3, %v161_v2 }
  0x36   :  { %v182_v15 = vand.u32 4294901760, %v181_v4  ;;  %v201_v16 = vand.u32 4294901760, %v1428_v57  ;;  %v208_v17 = vand.u32 4294901760, %v1430_v58  ;;  %v1464_v19 = vsub.f32 %v1360_v27, %v96_v33 }
  0x37   :  { %v1469_v20 = vsub.f32 %v1362_v28, %v99_v34  ;;  %v1141_v21 = vpack.c.bf16 %v180_v56, %v173_v52  ;;  %v189_v22 = vand.u32 4294901760, %v188_v10  ;;  %v196_v24 = vand.u32 4294901760, %v195_v11 }
  0x38   :  { %1052 = vmatpush3.bf16.msra.mxu1 %v1354_v23  ;;  %1124 = vmatpush3.bf16.msra.mxu0 %v1354_v23  ;;  %v215_v25 = vand.u32 4294901760, %v1448_v5  ;;  %v1069_v26 = vpack.c.bf16 %v182_v15, %v175_v9  ;;  %v202_v45 = vsub.f32 %v1428_v57, %v201_v16  ;;  %v209_v27 = vsub.f32 %v1430_v58, %v208_v17 }
  0x39   :  { %1053 = vmatprep.subr.bf16.mxu1 %v1278_v0  ;;  %1125 = vmatprep.subr.bf16.mxu0 %v1278_v0  ;;  %v222_v33 = vand.u32 4294901760, %v1451_v6  ;;  %v1480_v28 = vsub.f32 %v1376_v35, %v102_v39  ;;  %v1485_v34 = vsub.f32 %v1380_v36, %v105_v42  ;;  %v1072_v46 = vpack.c.bf16 %v196_v24, %v189_v22 }
  0x3a   :  { %v216_v52 = vsub.f32 %v1448_v5, %v215_v25  ;;  %v229_v54 = vand.u32 4294901760, %v1464_v19  ;;  %v203_v35 = vand.u32 4294901760, %v202_v45  ;;  %v210_v39 = vand.u32 4294901760, %v209_v27 }
  0x3b   :  { %v223_v55 = vsub.f32 %v1451_v6, %v222_v33  ;;  %v236_v36 = vand.u32 4294901760, %v1469_v20  ;;  %v1500_v42 = vsub.f32 %v1399_v43, %v108_v49  ;;  %v1505_v56 = vsub.f32 %v1401_v44, %v111_v50 }
  0x3c   :  { %1055 = vmatpush3.bf16.msra.mxu1 %v1372_v32  ;;  %1127 = vmatpush3.bf16.msra.mxu0 %v1372_v32  ;;  %v1147_v59 = vpack.c.bf16 %v208_v17, %v201_v16  ;;  %v217_v60 = vand.u32 4294901760, %v216_v52  ;;  %v1075_v2 = vpack.c.bf16 %v210_v39, %v203_v35  ;;  %v250_v43 = vand.u32 4294901760, %v1485_v34 }
  0x3d   :  { %1056 = vmatprep.subr.bf16.mxu1 %v1278_v0  ;;  %1128 = vmatprep.subr.bf16.mxu0 %v1278_v0  ;;  %v224_v3 = vand.u32 4294901760, %v223_v55  ;;  %v237_v4 = vsub.f32 %v1469_v20, %v236_v36  ;;  %v1150_v44 = vpack.c.bf16 %v222_v33, %v215_v25  ;;  %v264_v11 = vand.u32 4294901760, %v1505_v56 }
  0x3e   :  { %v251_v10 = vsub.f32 %v1485_v34, %v250_v43 }
  0x3f   :  { %v238_v9 = vand.u32 4294901760, %v237_v4  ;;  %v265_v22 = vsub.f32 %v1505_v56, %v264_v11 }
  0x40   :  { %1058 = vmatpush3.bf16.msra.mxu1 %v1396_v41  ;;  %1130 = vmatpush3.bf16.msra.mxu0 %v1396_v41  ;;  %v252_v17 = vand.u32 4294901760, %v251_v10 }
  0x41   :  { %1059 = vmatprep.subr.bf16.mxu1 %v1278_v0  ;;  %1131 = vmatprep.subr.bf16.mxu0 %v1278_v0  ;;  %v266_v45 = vand.u32 4294901760, %v265_v22 }
  0x44   :  { %1061 = vmatpush3.bf16.msra.mxu1 %v1421_v53  ;;  %1133 = vmatpush3.bf16.msra.mxu0 %v1421_v53 }
  0x45   :  { %1062 = vmatprep.subr.bf16.mxu1 %v1278_v0  ;;  %1134 = vmatprep.subr.bf16.mxu0 %v1278_v0 }
  0x48   :  { %1064 = vmatpush3.bf16.msra.mxu1 %v1442_v63  ;;  %1136 = vmatpush3.bf16.msra.mxu0 %v1442_v63 }
  0x49   :  { %1065 = vmatprep.subr.bf16.mxu1 %v1278_v0  ;;  %1137 = vmatprep.subr.bf16.mxu0 %v1278_v0 }
  0x4b   :  { %864 = vmatmul.mubr.f32.vlgmr.msra.gmra.mrb[0].mxu1 %v150_v8  ;;  %969 = vmatmul.mubr.f32.vlgmr.msra.gmra.mrb[0].mxu0 %v148_v51  ;;  %v1144_v51 = vpack.c.bf16 %v194_v62, %v187_v61  ;;  %v230_v61 = vsub.f32 %v1464_v19, %v229_v54  ;;  %v243_v62 = vand.u32 4294901760, %v1480_v28  ;;  %v1078_v8 = vpack.c.bf16 %v224_v3, %v217_v60 }
  0x4c   :  { %1067 = vmatpush3.bf16.msra.mxu1 %v1066_v14  ;;  %1139 = vmatpush3.bf16.msra.mxu0 %v1138_v7  ;;  %v257_v7 = vand.u32 4294901760, %v1500_v42  ;;  %v1153_v14 = vpack.c.bf16 %v236_v36, %v229_v54 }
  0x4d   :  { %1068 = vmatprep.subr.bf16.mxu1 %v1278_v0  ;;  %1140 = vmatprep.subr.bf16.mxu0 %v1278_v0  ;;  %v231_v49 = vand.u32 4294901760, %v230_v61  ;;  %v244_v50 = vsub.f32 %v1480_v28, %v243_v62  ;;  %v1156_v25 = vpack.c.bf16 %v250_v43, %v243_v62 }
  0x4e   :  { %898 = vmatprep.mubr.msk.f32.mxu1 %vm1279_vm0, %v1280_v1  ;;  %1003 = vmatprep.mubr.msk.f32.mxu0 %vm1279_vm0, %v1280_v1  ;;  %v1159_v33 = vpack.c.bf16 %v264_v11, %v257_v7 }
  0x4f   :  { %v245_v15 = vand.u32 4294901760, %v244_v50  ;;  %v1081_v16 = vpack.c.bf16 %v238_v9, %v231_v49 }
  0x50   :  { %1070 = vmatpush3.bf16.msra.mxu1 %v1069_v26  ;;  %1142 = vmatpush3.bf16.msra.mxu0 %v1141_v21  ;;  %v258_v21 = vsub.f32 %v1500_v42, %v257_v7 }
  0x51   :  { %1071 = vmatprep.subr.bf16.mxu1 %v1278_v0  ;;  %1143 = vmatprep.subr.bf16.mxu0 %v1278_v0  ;;  %v1084_v24 = vpack.c.bf16 %v252_v17, %v245_v15 }
  0x52   :  { %v259_v26 = vand.u32 4294901760, %v258_v21 }
  0x54   :  { %1073 = vmatpush3.bf16.msra.mxu1 %v1072_v46  ;;  %1145 = vmatpush3.bf16.msra.mxu0 %v1144_v51  ;;  %v1087_v27 = vpack.c.bf16 %v266_v45, %v259_v26  ;;  %v1090_v46 = vpack.c.bf16 %v1368_v31, %v1364_v29  ;;  %v1093_v51 = vpack.c.bf16 %v1384_v38, %v1382_v37 }
  0x55   :  { %1074 = vmatprep.subr.bf16.mxu1 %v1278_v0  ;;  %1146 = vmatprep.subr.bf16.mxu0 %v1278_v0  ;;  %v1096_v29 = vpack.c.bf16 %v1409_v48, %v1407_v47 }
  0x58   :  { %1076 = vmatpush3.bf16.msra.mxu1 %v1075_v2  ;;  %1148 = vmatpush3.bf16.msra.mxu0 %v1147_v59 }
  0x59   :  { %1077 = vmatprep.subr.bf16.mxu1 %v1278_v0  ;;  %1149 = vmatprep.subr.bf16.mxu0 %v1278_v0 }
  0x5c   :  { %1079 = vmatpush3.bf16.msra.mxu1 %v1078_v8  ;;  %1151 = vmatpush3.bf16.msra.mxu0 %v1150_v44 }
  0x5d   :  { %1080 = vmatprep.subr.bf16.mxu1 %v1278_v0  ;;  %1152 = vmatprep.subr.bf16.mxu0 %v1278_v0 }
  0x60   :  { %1082 = vmatpush3.bf16.msra.mxu1 %v1081_v16  ;;  %1154 = vmatpush3.bf16.msra.mxu0 %v1153_v14 }
  0x61   :  { %1083 = vmatprep.subr.bf16.mxu1 %v1278_v0  ;;  %1155 = vmatprep.subr.bf16.mxu0 %v1278_v0 }
  0x64   :  { %1085 = vmatpush3.bf16.msra.mxu1 %v1084_v24  ;;  %1157 = vmatpush3.bf16.msra.mxu0 %v1156_v25 }
  0x65   :  { %1086 = vmatprep.subr.bf16.mxu1 %v1278_v0  ;;  %1158 = vmatprep.subr.bf16.mxu0 %v1278_v0 }
  0x68   :  { %1088 = vmatpush3.bf16.msra.mxu1 %v1087_v27  ;;  %1160 = vmatpush3.bf16.msra.mxu0 %v1159_v33 }
  0x69   :  { %1089 = vmatprep.subr.bf16.mxu1 %v1278_v0  ;;  %1161 = vmatprep.subr.bf16.mxu0 %v1278_v0 }
  0x6b   :  { %899 = vmatmul.mubr.f32.vlgmr.msra.gmra.mrb[0].mxu1 %v1366_v30  ;;  %1004 = vmatmul.mubr.f32.vlgmr.msra.gmra.mrb[0].mxu0 %v1366_v30 }
  0x6c   :  { %1091 = vmatpush3.bf16.msra.mxu1 %v1090_v46  ;;  %1163 = vmatpush3.bf16.msra.mxu0 %v1334_v12  ;;  %v1099_v12 = vpack.c.bf16 %v1430_v58, %v1428_v57 }
  0x6d   :  { %1092 = vmatprep.subr.bf16.mxu1 %v1278_v0  ;;  %1164 = vmatprep.subr.bf16.mxu0 %v1278_v0 }
  0x6e   :  { %933 = vmatprep.mubr.msk.f32.mxu1 %vm1279_vm0, %v1280_v1  ;;  %1038 = vmatprep.mubr.msk.f32.mxu0 %vm1279_vm0, %v1280_v1  ;;  %v1102_v1 = vpack.c.bf16 %v1451_v6, %v1448_v5 }
  0x70   :  { %1094 = vmatpush3.bf16.msra.mxu1 %v1093_v51  ;;  %1166 = vmatpush3.bf16.msra.mxu0 %v1338_v13  ;;  %v1105_v13 = vpack.c.bf16 %v1469_v20, %v1464_v19 }
  0x71   :  { %1095 = vmatprep.subr.bf16.mxu1 %v1278_v0  ;;  %1167 = vmatprep.subr.bf16.mxu0 %v1278_v0 }
  0x74   :  { %1097 = vmatpush3.bf16.msra.mxu1 %v1096_v29  ;;  %1169 = vmatpush3.bf16.msra.mxu0 %v1344_v18  ;;  %v1108_v18 = vpack.c.bf16 %v1485_v34, %v1480_v28 }
  0x75   :  { %1098 = vmatprep.subr.bf16.mxu1 %v1278_v0  ;;  %1170 = vmatprep.subr.bf16.mxu0 %v1278_v0 }
  0x78   :  { %1100 = vmatpush3.bf16.msra.mxu1 %v1099_v12  ;;  %1172 = vmatpush3.bf16.msra.mxu0 %v1354_v23  ;;  %v1111_v23 = vpack.c.bf16 %v1505_v56, %v1500_v42 }
  0x79   :  { %1101 = vmatprep.subr.bf16.mxu1 %v1278_v0  ;;  %1173 = vmatprep.subr.bf16.mxu0 %v1278_v0 }
  0x7c   :  { %1103 = vmatpush3.bf16.msra.mxu1 %v1102_v1  ;;  %1175 = vmatpush3.bf16.msra.mxu0 %v1372_v32 }
  0x7d   :  { %1104 = vmatprep.subr.bf16.mxu1 %v1278_v0  ;;  %1176 = vmatprep.subr.bf16.mxu0 %v1278_v0 }
  0x80   :  { %1106 = vmatpush3.bf16.msra.mxu1 %v1105_v13  ;;  %1178 = vmatpush3.bf16.msra.mxu0 %v1396_v41 }
  0x81   :  { %1107 = vmatprep.subr.bf16.mxu1 %v1278_v0  ;;  %1179 = vmatprep.subr.bf16.mxu0 %v1278_v0 }
  0x84   :  { %1109 = vmatpush3.bf16.msra.mxu1 %v1108_v18  ;;  %1181 = vmatpush3.bf16.msra.mxu0 %v1421_v53 }
  0x85   :  { %1110 = vmatprep.subr.bf16.mxu1 %v1278_v0  ;;  %1182 = vmatprep.subr.bf16.mxu0 %v1278_v0 }
  0x88   :  { %1112 = vmatpush3.bf16.msra.mxu1 %v1111_v23  ;;  %1184 = vmatpush3.bf16.msra.mxu0 %v1442_v63 }
  0x8b   :  { %934 = vmatmul.mubr.f32.vlgmr.msra.gmra.mrb[0].mxu1 %v1388_v40  ;;  %1039 = vmatmul.mubr.f32.vlgmr.msra.gmra.mrb[0].mxu0 %v1366_v30 }
 0x15e   :  { %v407_v31 = vpop.f32.mrb[0].mxu1  ;;  %v702_v32 = vpop.f32.mrb[0].mxu0 }
 0x15f   :  { %v1185_v37 = vadd.f32 %v702_v32, %v407_v31  ;;  %v935_v38 = vpop.f32.mrb[1].mxu1  ;;  %v1040_v41 = vpop.f32.mrb[1].mxu0 }
 0x161   :  { %712 = vst [vmem:[#allocation8] sm:$0xff] %v1185_v37 }
 0x162   :  { %1257 = shalt.err (!%p1254_p6)
}
 0x163   :  { %s1258_s10 = scalar_lea.hbm %s1589_s2, 128 }
 0x164   :  { %p1259_p7 = scmp.ne.s32.totalorder %s1589_s2, %s1258_s10  ;;  %p1262_p8 = scmp.lt.u32.totalorder %s1258_s10, %s1589_s2 }
 0x166   :  { %p1264_p9 = pnand %p1262_p8, %p1259_p7 }
 0x168   :  { %1267 = shalt.err (!%p1264_p9)
}
 0x169   :  { %722 = dma.vmem_to_hbm [thread:$0]  %s720_s6, 128, %s1589_s2, [#allocation5]  }
 0x16a   :  { %1272 = dma.done.wait [#allocation5], 128  }
 0x16b   :  { %1273 = vsyncadd [#allocation5], 4294967168 }
 0x16c   :  { %726 = vsyncpa [#allocation4], 1 }
 0x16d   :  { %727 = vsyncpa [#allocation7], 1 }
 0x16e   :  { %728 = vsyncpa [#allocation5], 1 }

</bundles_post_ra>
